<compile_context>
chip_gen: v7x
topology: tpu7x:2x2x1
jax: 0.10.0
libtpu: 0.0.40
codegen_flags: <defaults>
</compile_context>

<pallas_src>
import functools
import math

import jax
import jax.numpy as jnp
from jax.experimental import pallas as pl
from jax.experimental.pallas import tpu as pltpu

COMPUTE_DTYPE = jnp.bfloat16          # MXU input dtype (f32 accumulation kept)

_VMEM_LIMIT = None


def _vmem_limit():
    """~3/4 of physical VMEM (96 MiB on v5e/v6e, 48 MiB on v7x)."""
    global _VMEM_LIMIT
    if _VMEM_LIMIT is None:
        try:
            cap = pltpu.get_tpu_info().vmem_capacity_bytes
            _VMEM_LIMIT = int(min(96 * 1024 * 1024, (cap * 3) // 4))
        except Exception:
            _VMEM_LIMIT = 48 * 1024 * 1024
    return _VMEM_LIMIT


# --------------------------------------------------------------------------
# helpers
# --------------------------------------------------------------------------
def _fit_tile(dim, pref, quantum):
    """Largest multiple of `quantum` <= pref that divides dim; else full dim."""
    if dim <= pref:
        return dim
    if dim % quantum != 0:
        return dim
    t = (min(pref, dim) // quantum) * quantum
    while t >= quantum:
        if dim % t == 0:
            return t
        t -= quantum
    return dim


def _row_tile(dim, pref, quantum):
    """Row tile that also tries to leave >=2 blocks (v7x megacore sharding)."""
    pref = min(pref, max(quantum, dim // 2))
    return _fit_tile(dim, pref, quantum)


def _layernorm_f32(x, g, b, eps):
    """torch-style LayerNorm: unbiased std, eps added to std. x is f32."""
    d = x.shape[-1]
    mean = jnp.mean(x, axis=-1, keepdims=True)
    xc = x - mean
    var = jnp.sum(xc * xc, axis=-1, keepdims=True) * (1.0 / (d - 1))
    inv = pl.reciprocal(jnp.sqrt(var) + eps, approx=False)
    return g * xc * inv + b


def _cparams(sems):
    return pltpu.CompilerParams(dimension_semantics=sems,
                                vmem_limit_bytes=_vmem_limit())


# --------------------------------------------------------------------------
# fused LayerNorm + Linear (LN cached in VMEM scratch, computed once per row tile)
# --------------------------------------------------------------------------
def _ln_linear_kernel(x_ref, g_ref, b_ref, w_ref, bias_ref, o_ref, ln_sc,
                      *, eps, activation):
    @pl.when(pl.program_id(1) == 0)
    def _():
        x = x_ref[...].astype(jnp.float32)
        y = _layernorm_f32(x, g_ref[...].astype(jnp.float32),
                           b_ref[...].astype(jnp.float32), eps)
        ln_sc[...] = y.astype(ln_sc.dtype)

    acc = jnp.dot(ln_sc[...], w_ref[...], preferred_element_type=jnp.float32)
    acc = acc + bias_ref[...].astype(jnp.float32)
    if activation == "relu":
        acc = jnp.maximum(acc, 0.0)
    o_ref[...] = acc.astype(o_ref.dtype)


def ln_linear(x2d, gamma, beta, w, b, activation=None, eps=1e-6, out_dtype=None):
    M, D = x2d.shape
    N = w.shape[1]
    out_dtype = out_dtype or x2d.dtype
    tm = _row_tile(M, 512, 16)            # bf16 output rows -> 16-sublane quantum
    tn = _fit_tile(N, 512, 128)
    return pl.pallas_call(
        functools.partial(_ln_linear_kernel, eps=eps, activation=activation),
        out_shape=jax.ShapeDtypeStruct((M, N), out_dtype),
        grid=(M // tm, N // tn),
        in_specs=[
            pl.BlockSpec((tm, D), lambda i, j: (i, 0)),
            pl.BlockSpec((1, D), lambda i, j: (0, 0)),
            pl.BlockSpec((1, D), lambda i, j: (0, 0)),
            pl.BlockSpec((D, tn), lambda i, j: (0, j)),
            pl.BlockSpec((1, tn), lambda i, j: (0, j)),
        ],
        out_specs=pl.BlockSpec((tm, tn), lambda i, j: (i, j)),
        scratch_shapes=[pltpu.VMEM((tm, D), COMPUTE_DTYPE)],
        compiler_params=_cparams(("parallel", "arbitrary")),
    )(x2d, gamma.reshape(1, D), beta.reshape(1, D),
      w.astype(COMPUTE_DTYPE), b.reshape(1, N).astype(jnp.float32))


# --------------------------------------------------------------------------
# generic tiled Linear (f32 accumulator, K as "arbitrary" reduction axis)
# --------------------------------------------------------------------------
def _linear_kernel(x_ref, w_ref, b_ref, o_ref, acc_ref, *, activation):
    @pl.when(pl.program_id(2) == 0)
    def _():
        acc_ref[...] = jnp.zeros_like(acc_ref)

    acc_ref[...] += jnp.dot(x_ref[...].astype(w_ref.dtype), w_ref[...],
                            preferred_element_type=jnp.float32)

    @pl.when(pl.program_id(2) == pl.num_programs(2) - 1)
    def _():
        acc = acc_ref[...] + b_ref[...].astype(jnp.float32)
        if activation == "relu":
            acc = jnp.maximum(acc, 0.0)
        o_ref[...] = acc.astype(o_ref.dtype)


def linear(x2d, w, b, activation=None, out_dtype=None):
    M, K = x2d.shape
    N = w.shape[1]
    out_dtype = out_dtype or x2d.dtype
    qm = 16 if x2d.dtype == COMPUTE_DTYPE else 8
    tm = _row_tile(M, 512, qm)            # large row tiles: weight re-streamed less
    tn = _fit_tile(N, 512, 128)
    tk = _fit_tile(K, 512, 128)
    return pl.pallas_call(
        functools.partial(_linear_kernel, activation=activation),
        out_shape=jax.ShapeDtypeStruct((M, N), out_dtype),
        grid=(M // tm, N // tn, K // tk),
        in_specs=[
            pl.BlockSpec((tm, tk), lambda i, j, k: (i, k)),
            pl.BlockSpec((tk, tn), lambda i, j, k: (k, j)),
            pl.BlockSpec((1, tn), lambda i, j, k: (0, j)),
        ],
        out_specs=pl.BlockSpec((tm, tn), lambda i, j, k: (i, j)),
        scratch_shapes=[pltpu.VMEM((tm, tn), jnp.float32)],
        compiler_params=_cparams(("parallel", "parallel", "arbitrary")),
    )(x2d, w.astype(COMPUTE_DTYPE), b.reshape(1, N).astype(jnp.float32))


# --------------------------------------------------------------------------
# flash-style multi-head attention + output projection + residual (fused)
# grid = (B, Tq/tq, H, Tk/tk); per-head (tq, dk) tiles selected by the BlockSpec
# (no in-kernel lane slicing); Wo applied as a per-head partial matmul into a
# resident (tq, D) output accumulator.
# --------------------------------------------------------------------------
def _attn_kernel(*refs, mask_kind):
    if mask_kind == "dense":
        (q_ref, k_ref, v_ref, bias_ref, wo_ref, bo_ref, res_ref,
         o_ref, m_sc, l_sc, acc_sc, out_sc) = refs
    else:
        (q_ref, k_ref, v_ref, wo_ref, bo_ref, res_ref,
         o_ref, m_sc, l_sc, acc_sc, out_sc) = refs
        bias_ref = None

    qi = pl.program_id(1)
    hi = pl.program_id(2)
    ki = pl.program_id(3)
    nh = pl.num_programs(2)
    nk = pl.num_programs(3)

    _, tq, dk = q_ref.shape
    tk = k_ref.shape[1]

    @pl.when(jnp.logical_and(hi == 0, ki == 0))
    def _init_out():            # residual + output-projection bias, f32 resident
        out_sc[...] = res_ref[0].astype(jnp.float32) + bo_ref[...].astype(jnp.float32)

    @pl.when(ki == 0)
    def _init_head():           # per-head online-softmax state
        m_sc[...] = jnp.full_like(m_sc, -1e30)
        l_sc[...] = jnp.zeros_like(l_sc)
        acc_sc[...] = jnp.zeros_like(acc_sc)

    def update():
        q = q_ref[0]            # (tq, dk) bf16, 1/sqrt(dk) already folded into Wq
        k = k_ref[0]            # (tk, dk) bf16
        v = v_ref[0]            # (tk, dk) bf16
        s = jax.lax.dot_general(q, k, (((1,), (1,)), ((), ())),
                                preferred_element_type=jnp.float32)   # (tq, tk)
        if mask_kind == "causal":   # mask generated in-kernel, no HBM traffic
            rows = jax.lax.broadcasted_iota(jnp.int32, (tq, tk), 0) + qi * tq
            cols = jax.lax.broadcasted_iota(jnp.int32, (tq, tk), 1) + ki * tk
            s = jnp.where(rows >= cols, s, -1e9)
        elif mask_kind == "dense":
            s = s + bias_ref[0]     # (1, tk) or (tq, tk), broadcast over rows
        m_prev = m_sc[...]
        m_new = jnp.maximum(m_prev, jnp.max(s, axis=-1, keepdims=True))
        alpha = jnp.exp(m_prev - m_new)
        p = jnp.exp(s - m_new)
        l_sc[...] = alpha * l_sc[...] + jnp.sum(p, axis=-1, keepdims=True)
        acc_sc[...] = alpha * acc_sc[...] + jnp.dot(
            p.astype(v.dtype), v, preferred_element_type=jnp.float32)
        m_sc[...] = m_new

    if mask_kind == "causal":
        # Skip KV tiles strictly above the diagonal (fully masked).
        pl.when(ki * tk <= (qi + 1) * tq - 1)(update)
    else:
        update()

    @pl.when(ki == nk - 1)
    def _fold_head():           # out += (acc / l) @ Wo[h*dk:(h+1)*dk, :]
        inv = pl.reciprocal(l_sc[...], approx=False)
        ctx = (acc_sc[...] * inv).astype(wo_ref.dtype)               # (tq, dk)
        out_sc[...] += jnp.dot(ctx, wo_ref[...], preferred_element_type=jnp.float32)

    @pl.when(jnp.logical_and(hi == nh - 1, ki == nk - 1))
    def _store():
        o_ref[0] = out_sc[...].astype(o_ref.dtype)


def attention(q_arr, q_col, kv_arr, k_col, v_col, wo, bo, residual, nheads, mask):
    """q_arr/kv_arr carry (possibly concatenated) D-wide projections on lanes;
    q_col/k_col/v_col pick which D-wide column group is Q/K/V. `mask` may be a
    dense array, the string "causal", or None."""
    B, Tq, _ = q_arr.shape
    Tk = kv_arr.shape[1]
    D = residual.shape[-1]
    assert D % nheads == 0
    dk = D // nheads
    H = nheads

    tq_pref = 256
    if B == 1:
        tq_pref = min(tq_pref, max(16, Tq // 2))   # keep >=2 parallel blocks (v7x)
    tq = _fit_tile(Tq, tq_pref, 16)
    tk = _fit_tile(Tk, 256, 16)

    if isinstance(mask, str) and mask == "causal":
        mask_kind = "causal"
    elif mask is None:
        mask_kind = "none"
    else:
        mask_kind = "dense"
        m = jnp.asarray(mask)
        if m.ndim == 2:
            m = m[None]
        elif m.ndim == 4:               # torch-style (B, 1, Tq, Tk)
            m = m.reshape(m.shape[0], m.shape[-2], m.shape[-1])
        # Compact bias: no broadcast to (B, Tq, Tk) in HBM.
        bias_arr = jnp.where(m == 0, -1e9, 0.0).astype(jnp.float32)
        Bm, Rm, _ = bias_arr.shape
        assert Bm in (1, B) and Rm in (1, Tq)
        b_bcast = (Bm == B)
        r_bcast = (Rm == Tq)
        rb = tq if r_bcast else 1

    in_specs = [
        pl.BlockSpec((1, tq, dk), lambda b, i, h, k: (b, i, q_col * H + h)),
        pl.BlockSpec((1, tk, dk), lambda b, i, h, k: (b, k, k_col * H + h)),
        pl.BlockSpec((1, tk, dk), lambda b, i, h, k: (b, k, v_col * H + h)),
    ]
    inputs = [q_arr, kv_arr, kv_arr]
    if mask_kind == "dense":
        in_specs.append(pl.BlockSpec(
            (1, rb, tk),
            lambda b, i, h, k: (b if b_bcast else 0, i if r_bcast else 0, k)))
        inputs.append(bias_arr)
    in_specs += [
        pl.BlockSpec((dk, D), lambda b, i, h, k: (h, 0)),       # per-head Wo slice
        pl.BlockSpec((1, D), lambda b, i, h, k: (0, 0)),
        pl.BlockSpec((1, tq, D), lambda b, i, h, k: (b, i, 0)),  # residual
    ]
    inputs += [wo.astype(COMPUTE_DTYPE), bo.reshape(1, D).astype(jnp.float32), residual]

    return pl.pallas_call(
        functools.partial(_attn_kernel, mask_kind=mask_kind),
        out_shape=jax.ShapeDtypeStruct((B, Tq, D), residual.dtype),
        grid=(B, Tq // tq, nheads, Tk // tk),
        in_specs=in_specs,
        out_specs=pl.BlockSpec((1, tq, D), lambda b, i, h, k: (b, i, 0)),
        scratch_shapes=[
            pltpu.VMEM((tq, 1), jnp.float32),    # running max m
            pltpu.VMEM((tq, 1), jnp.float32),    # running sum l
            pltpu.VMEM((tq, dk), jnp.float32),   # running weighted V (per head)
            pltpu.VMEM((tq, D), jnp.float32),    # residual + sum_h ctx_h @ Wo_h
        ],
        compiler_params=_cparams(("parallel", "parallel", "arbitrary", "arbitrary")),
    )(*inputs)


# --------------------------------------------------------------------------
# fused FFN: LN + Linear1 + ReLU + Linear2 + residual.
# d_ff is a reduction grid axis so only (D, tff)+(tff, D) weight slices are
# resident (v7x-friendly); the normalized activations are cached in VMEM and
# the hidden activation never touches HBM.
# --------------------------------------------------------------------------
def _ffn_kernel(x_ref, g_ref, b_ref, w1_ref, b1_ref, w2_ref, b2_ref, o_ref,
                ln_sc, acc_sc, *, eps):
    j = pl.program_id(1)

    @pl.when(j == 0)
    def _():
        x = x_ref[...].astype(jnp.float32)
        y = _layernorm_f32(x, g_ref[...].astype(jnp.float32),
                           b_ref[...].astype(jnp.float32), eps)
        ln_sc[...] = y.astype(ln_sc.dtype)
        acc_sc[...] = x                      # residual

    h = jnp.dot(ln_sc[...], w1_ref[...], preferred_element_type=jnp.float32)
    h = jnp.maximum(h + b1_ref[...].astype(jnp.float32), 0.0)
    acc_sc[...] += jnp.dot(h.astype(w2_ref.dtype), w2_ref[...],
                           preferred_element_type=jnp.float32)

    @pl.when(j == pl.num_programs(1) - 1)
    def _():
        o_ref[...] = (acc_sc[...] + b2_ref[...].astype(jnp.float32)).astype(o_ref.dtype)


def ffn_fused(x2d, gamma, beta, w1, b1, w2, b2, eps=1e-6):
    M, D = x2d.shape
    DFF = w1.shape[1]
    tm = _row_tile(M, 256, 8)
    tff = _fit_tile(DFF, 512, 128)
    return pl.pallas_call(
        functools.partial(_ffn_kernel, eps=eps),
        out_shape=jax.ShapeDtypeStruct((M, D), x2d.dtype),
        grid=(M // tm, DFF // tff),
        in_specs=[
            pl.BlockSpec((tm, D), lambda i, j: (i, 0)),
            pl.BlockSpec((1, D), lambda i, j: (0, 0)),
            pl.BlockSpec((1, D), lambda i, j: (0, 0)),
            pl.BlockSpec((D, tff), lambda i, j: (0, j)),
            pl.BlockSpec((1, tff), lambda i, j: (0, j)),
            pl.BlockSpec((tff, D), lambda i, j: (j, 0)),
            pl.BlockSpec((1, D), lambda i, j: (0, 0)),
        ],
        out_specs=pl.BlockSpec((tm, D), lambda i, j: (i, 0)),
        scratch_shapes=[pltpu.VMEM((tm, D), COMPUTE_DTYPE),   # cached LN(x)
                        pltpu.VMEM((tm, D), jnp.float32)],    # residual + FFN acc
        compiler_params=_cparams(("parallel", "arbitrary")),
    )(x2d, gamma.reshape(1, D), beta.reshape(1, D),
      w1.astype(COMPUTE_DTYPE), b1.reshape(1, DFF).astype(jnp.float32),
      w2.astype(COMPUTE_DTYPE), b2.reshape(1, D).astype(jnp.float32))


# --------------------------------------------------------------------------
# DecoderLayer forward
# --------------------------------------------------------------------------
def decoder_layer(x, memory, src_mask, tgt_mask, params):
    """masks may be: a dense array (broadcastable to (B, Tq, Tk)), the string
    "causal" (generated in-kernel), or None (no masking)."""
    B, T, D = x.shape
    S = memory.shape[1]
    h = params["h"]
    dk = D // h
    scale = 1.0 / math.sqrt(dk)              # folded into Wq/bq (saves a VPU mul/tile)

    # ---- sublayer 0: x = x + SelfAttn(LN0(x)) ------------------------------
    sa = params["self_attn"]
    wqkv = jnp.concatenate([sa["wq"] * scale, sa["wk"], sa["wv"]], axis=1)   # (D, 3D)
    bqkv = jnp.concatenate([sa["bq"] * scale, sa["bk"], sa["bv"]])
    qkv = ln_linear(x.reshape(B * T, D), params["ln0_g"], params["ln0_b"],
                    wqkv, bqkv, out_dtype=COMPUTE_DTYPE).reshape(B, T, 3 * D)
    x = attention(qkv, 0, qkv, 1, 2, sa["wo"], sa["bo"], x, h, tgt_mask)

    # ---- sublayer 1: x = x + SrcAttn(LN1(x), memory) -----------------------
    ca = params["src_attn"]
    q = ln_linear(x.reshape(B * T, D), params["ln1_g"], params["ln1_b"],
                  ca["wq"] * scale, ca["bq"] * scale,
                  out_dtype=COMPUTE_DTYPE).reshape(B, T, D)
    wkv = jnp.concatenate([ca["wk"], ca["wv"]], axis=1)                      # (D, 2D)
    bkv = jnp.concatenate([ca["bk"], ca["bv"]])
    kv = linear(memory.reshape(B * S, D).astype(COMPUTE_DTYPE), wkv, bkv,
                out_dtype=COMPUTE_DTYPE).reshape(B, S, 2 * D)
    x = attention(q, 0, kv, 0, 1, ca["wo"], ca["bo"], x, h, src_mask)

    # ---- sublayer 2: x = x + FFN(LN2(x)) ------------------------------------
    out = ffn_fused(x.reshape(B * T, D), params["ln2_g"], params["ln2_b"],
                    params["ff_w1"], params["ff_b1"],
                    params["ff_w2"], params["ff_b2"])
    return out.reshape(B, T, D)


# --------------------------------------------------------------------------
# parameter init (weights stored f32, cast to bf16 at the kernel boundary)
# --------------------------------------------------------------------------
def init_params(key, d_model, h, d_ff):
    def dense(k, din, dout):
        kw, kb = jax.random.split(k)
        w = jax.random.normal(kw, (din, dout), jnp.float32) * 0.02
        b = jax.random.normal(kb, (dout,), jnp.float32) * 0.02
        return w, b

    keys = jax.random.split(key, 12)

    def attn_params(ks):
        wq, bq = dense(ks[0], d_model, d_model)
        wk, bk = dense(ks[1], d_model, d_model)
        wv, bv = dense(ks[2], d_model, d_model)
        wo, bo = dense(ks[3], d_model, d_model)
        return dict(wq=wq, bq=bq, wk=wk, bk=bk, wv=wv, bv=bv, wo=wo, bo=bo)

    ff_w1, ff_b1 = dense(keys[8], d_model, d_ff)
    ff_w2, ff_b2 = dense(keys[9], d_ff, d_model)
    ones = jnp.ones((d_model,), jnp.float32)
    zeros = jnp.zeros((d_model,), jnp.float32)
    return dict(
        h=h,
        self_attn=attn_params(keys[0:4]),
        src_attn=attn_params(keys[4:8]),
        ff_w1=ff_w1, ff_b1=ff_b1, ff_w2=ff_w2, ff_b2=ff_b2,
        ln0_g=ones, ln0_b=zeros,
        ln1_g=ones, ln1_b=zeros,
        ln2_g=ones, ln2_b=zeros,
    )


if __name__ == "__main__":
    B, T, S, D, H, DFF = 2, 8, 16, 32, 4, 64
    key = jax.random.PRNGKey(0)
    kx, km, kp = jax.random.split(key, 3)
    x = jax.random.normal(kx, (B, T, D), jnp.float32)
    memory = jax.random.normal(km, (B, S, D), jnp.float32)
    params = init_params(kp, D, H, DFF)

    # Fast path: causal tgt mask generated in-kernel, all-ones src mask skipped.
    out_fast = decoder_layer(x, memory, src_mask=None, tgt_mask="causal", params=params)
    out_fast = jax.block_until_ready(out_fast)

    # Dense-mask path (explicit tensors, matches the PyTorch call signature).
    tgt_mask = jnp.tril(jnp.ones((T, T), jnp.int32))[None, :, :].repeat(B, axis=0)
    src_mask = jnp.ones((B, 1, S), jnp.int32)
    out_dense = decoder_layer(x, memory, src_mask=src_mask, tgt_mask=tgt_mask, params=params)
    out_dense = jax.block_until_ready(out_dense)

    assert out_fast.shape == (B, T, D)
    assert bool(jnp.all(jnp.isfinite(out_fast)))
    assert bool(jnp.allclose(out_fast, out_dense, atol=1e-3, rtol=1e-3))
    print("KERNEL_OK")
</pallas_src>

<mosaic_0001>
module attributes {stable_mosaic.version = 11 : i64} {
  func.func @_ln_linear_kernel(%arg0: i32, %arg1: i32, %arg2: memref<16x32xf32, #tpu.memory_space<vmem>>, %arg3: memref<1x32xf32, #tpu.memory_space<vmem>>, %arg4: memref<1x32xf32, #tpu.memory_space<vmem>>, %arg5: memref<32x96xbf16, #tpu.memory_space<vmem>>, %arg6: memref<1x96xf32, #tpu.memory_space<vmem>>, %arg7: memref<16x96xbf16, #tpu.memory_space<vmem>>, %arg8: memref<16x32xbf16, #tpu.memory_space<vmem>>) attributes {dimension_semantics = [#tpu.dimension_semantics<parallel>, #tpu.dimension_semantics<arbitrary>], iteration_bounds = array<i64: 1, 1>, scalar_prefetch = 0 : i64, scratch_operands = 1 : i64, tpu.core_type = #tpu.core_type<tc>, window_params = [{transform_indices = @transform_0, window_bounds = array<i64: 16, 32>}, {pipeline_mode = #tpu.pipeline_mode<synchronous>, transform_indices = @transform_1, window_bounds = array<i64: 1, 32>}, {pipeline_mode = #tpu.pipeline_mode<synchronous>, transform_indices = @transform_2, window_bounds = array<i64: 1, 32>}, {transform_indices = @transform_3, window_bounds = array<i64: 32, 96>}, {transform_indices = @transform_4, window_bounds = array<i64: 1, 96>}, {transform_indices = @transform_5, window_bounds = array<i64: 16, 96>}]} {
    %c0_i32 = arith.constant 0 : i32
    %0 = arith.cmpi eq, %arg1, %c0_i32 : i32
    %1 = arith.extui %0 : i1 to i32
    %c0_i32_0 = arith.constant 0 : i32
    %2 = arith.cmpi ne, %1, %c0_i32_0 : i32
    scf.if %2 {
      %c0_8 = arith.constant 0 : index
      %c0_9 = arith.constant 0 : index
      %11 = vector.load %arg2[%c0_8, %c0_9] : memref<16x32xf32, #tpu.memory_space<vmem>>, vector<16x32xf32>
      %c0_10 = arith.constant 0 : index
      %c0_11 = arith.constant 0 : index
      %12 = vector.load %arg3[%c0_10, %c0_11] : memref<1x32xf32, #tpu.memory_space<vmem>>, vector<1x32xf32>
      %c0_12 = arith.constant 0 : index
      %c0_13 = arith.constant 0 : index
      %13 = vector.load %arg4[%c0_12, %c0_13] : memref<1x32xf32, #tpu.memory_space<vmem>>, vector<1x32xf32>
      %cst_14 = arith.constant dense<0.000000e+00> : vector<16xf32>
      %14 = vector.multi_reduction <add>, %11, %cst_14 [1] : vector<16x32xf32> to vector<16xf32>
      %15 = vector.shape_cast %14 : vector<16xf32> to vector<16x1xf32>
      %cst_15 = arith.constant 3.200000e+01 : f32
      %16 = vector.broadcast %cst_15 : f32 to vector<16x1xf32>
      %17 = arith.divf %15, %16 : vector<16x1xf32>
      %18 = vector.broadcast %17 : vector<16x1xf32> to vector<16x32xf32>
      %19 = arith.subf %11, %18 : vector<16x32xf32>
      %20 = arith.mulf %19, %19 : vector<16x32xf32>
      %cst_16 = arith.constant dense<0.000000e+00> : vector<16xf32>
      %21 = vector.multi_reduction <add>, %20, %cst_16 [1] : vector<16x32xf32> to vector<16xf32>
      %22 = vector.shape_cast %21 : vector<16xf32> to vector<16x1xf32>
      %cst_17 = arith.constant 0.0322580636 : f32
      %23 = vector.broadcast %cst_17 : f32 to vector<16x1xf32>
      %24 = arith.mulf %22, %23 : vector<16x1xf32>
      %25 = math.sqrt %24 : vector<16x1xf32>
      %cst_18 = arith.constant 9.99999997E-7 : f32
      %26 = vector.broadcast %cst_18 : f32 to vector<16x1xf32>
      %27 = arith.addf %25, %26 : vector<16x1xf32>
      %28 = tpu.reciprocal %27 : vector<16x1xf32> -> vector<16x1xf32>
      %29 = vector.broadcast %12 : vector<1x32xf32> to vector<16x32xf32>
      %30 = arith.mulf %29, %19 : vector<16x32xf32>
      %31 = vector.broadcast %28 : vector<16x1xf32> to vector<16x32xf32>
      %32 = arith.mulf %30, %31 : vector<16x32xf32>
      %33 = vector.broadcast %13 : vector<1x32xf32> to vector<16x32xf32>
      %34 = arith.addf %32, %33 : vector<16x32xf32>
      %35 = arith.truncf %34 : vector<16x32xf32> to vector<16x32xbf16>
      %c0_19 = arith.constant 0 : index
      %c0_20 = arith.constant 0 : index
      %36 = vector.load %arg8[%c0_19, %c0_20] : memref<16x32xbf16, #tpu.memory_space<vmem>>, vector<16x32xbf16>
      tpu.vector_store %arg8[%c0_19, %c0_20], %35 {strides = array<i32>} : memref<16x32xbf16, #tpu.memory_space<vmem>>, vector<16x32xbf16>,
    } else {
    }
    %c0 = arith.constant 0 : index
    %c0_1 = arith.constant 0 : index
    %3 = vector.load %arg8[%c0, %c0_1] : memref<16x32xbf16, #tpu.memory_space<vmem>>, vector<16x32xbf16>
    %c0_2 = arith.constant 0 : index
    %c0_3 = arith.constant 0 : index
    %4 = vector.load %arg5[%c0_2, %c0_3] : memref<32x96xbf16, #tpu.memory_space<vmem>>, vector<32x96xbf16>
    %cst = arith.constant dense<0.000000e+00> : vector<16x96xf32>
    %5 = tpu.matmul %3, %4, %cst {dimension_numbers = #tpu.dot_dimension_numbers<[1], [0], [0], [1], [0, 0, 1, 1], [], []>} : vector<16x32xbf16>, vector<32x96xbf16>, vector<16x96xf32> -> vector<16x96xf32>
    %c0_4 = arith.constant 0 : index
    %c0_5 = arith.constant 0 : index
    %6 = vector.load %arg6[%c0_4, %c0_5] : memref<1x96xf32, #tpu.memory_space<vmem>>, vector<1x96xf32>
    %7 = vector.broadcast %6 : vector<1x96xf32> to vector<16x96xf32>
    %8 = arith.addf %5, %7 : vector<16x96xf32>
    %9 = arith.truncf %8 : vector<16x96xf32> to vector<16x96xbf16>
    %c0_6 = arith.constant 0 : index
    %c0_7 = arith.constant 0 : index
    %10 = vector.load %arg7[%c0_6, %c0_7] : memref<16x96xbf16, #tpu.memory_space<vmem>>, vector<16x96xbf16>
    tpu.vector_store %arg7[%c0_6, %c0_7], %9 {strides = array<i32>} : memref<16x96xbf16, #tpu.memory_space<vmem>>, vector<16x96xbf16>,
    return
  }
  func.func @transform_0(%arg0: i32, %arg1: i32) -> (i32, i32) {
    %c0_i32 = arith.constant 0 : i32
    %c0_i32_0 = arith.constant 0 : i32
    return %arg0, %c0_i32 : i32, i32
  }
  func.func @transform_1(%arg0: i32, %arg1: i32) -> (i32, i32) {
    %c0_i32 = arith.constant 0 : i32
    %c0_i32_0 = arith.constant 0 : i32
    %c0_i32_1 = arith.constant 0 : i32
    return %c0_i32, %c0_i32_0 : i32, i32
  }
  func.func @transform_2(%arg0: i32, %arg1: i32) -> (i32, i32) {
    %c0_i32 = arith.constant 0 : i32
    %c0_i32_0 = arith.constant 0 : i32
    %c0_i32_1 = arith.constant 0 : i32
    return %c0_i32, %c0_i32_0 : i32, i32
  }
  func.func @transform_3(%arg0: i32, %arg1: i32) -> (i32, i32) {
    %c0_i32 = arith.constant 0 : i32
    %c0_i32_0 = arith.constant 0 : i32
    return %c0_i32, %arg1 : i32, i32
  }
  func.func @transform_4(%arg0: i32, %arg1: i32) -> (i32, i32) {
    %c0_i32 = arith.constant 0 : i32
    %c0_i32_0 = arith.constant 0 : i32
    return %c0_i32, %arg1 : i32, i32
  }
  func.func @transform_5(%arg0: i32, %arg1: i32) -> (i32, i32) {
    %c0_i32 = arith.constant 0 : i32
    return %arg0, %arg1 : i32, i32
  }
}

</mosaic_0001>

<bundles_post_ra>
// kernel: tpu_custom_call.1
= control target key start
LH: loop header
LB: loop body
LE: loop exit
PB: predicated region body
PF: predicated region fallthrough
CT: control target
= control target key end

     0   :  { %10 = vsyncpa [#allocation4], 0  ;;  %s424_s0 = inlined_call_operand.hbm [shape: f32[16,32], index: 0, kind: input, shape index: {}]   ;;  %s425_s1 = inlined_call_operand.vmem [shape: f32[1,32], index: 1, kind: input, shape index: {}]   ;;  %s426_s2 = inlined_call_operand.vmem [shape: f32[1,32], index: 2, kind: input, shape index: {}]   ;;  %s427_s3 = inlined_call_operand.hbm [shape: bf16[32,96], index: 3, kind: input, shape index: {}]   ;;  %s428_s4 = inlined_call_operand.vmem [shape: f32[1,96], index: 4, kind: input, shape index: {}]   ;;  %s429_s5 = inlined_call_operand.hbm [shape: bf16[16,96], index: 5, kind: output, shape index: {}]  }
   0x1   :  { %11 = vsyncpa [#allocation7], 0 }
   0x2   :  { %12 = vsyncpa [#allocation5], 0  ;;  %s328_s18 = smov [#allocation3]   ;;  %s256_s22 = scalar_lea.hbm %s424_s0, 256 }
   0x3   :  { %s18_s19 = sshll.u32 %s328_s18, 4  ;;  %p257_p0 = scmp.ne.s32.totalorder %s424_s0, %s256_s22  ;;  %s19_s19 = int_to_ptr.vmem [resolvable:$true] %s18_s19 }
   0x4   :  { %p260_p1 = scmp.lt.u32.totalorder %s256_s22, %s424_s0 }
   0x6   :  { %p262_p2 = pnand %p260_p1, %p257_p0 }
   0x8   :  { %265 = shalt.err (!%p262_p2)
}
   0x9   :  { %s266_s27 = scalar_lea.vmem %s19_s19, 256  ;;  %p271_p4 = scmp.lt.s32.totalorder %s19_s19, %s19_s19 }
   0xa   :  { %p267_p3 = scmp.ne.s32.totalorder %s19_s19, %s266_s27  ;;  %p272_p5 = scmp.lt.s32.totalorder %s266_s27, %s266_s27 }
   0xc   :  { %p273_p6 = por %p272_p5, %p271_p4 }
   0xe   :  { %p274_p7 = pnand %p273_p6, %p267_p3 }
  0x10   :  { %277 = shalt.err (!%p274_p7)
}
  0x11   :  { %s329_s28 = smov 128   ;;  %s330_s29 = smov 8  }
  0x12   :  { %24 = dma.hbm_to_vmem [thread:$0]  %s424_s0, 256, %s19_s19, [#allocation4], %s329_s28, %s329_s28, %s330_s29  }
  0x13   :  { %s331_s7 = smov [#allocation6]   ;;  %s278_s11 = scalar_lea.hbm %s427_s3, 256 }
  0x14   :  { %s34_s8 = sshll.u32 %s331_s7, 4  ;;  %p279_p8 = scmp.ne.s32.totalorder %s427_s3, %s278_s11  ;;  %s35_s8 = int_to_ptr.vmem [resolvable:$true] %s34_s8 }
  0x15   :  { %p282_p9 = scmp.lt.u32.totalorder %s278_s11, %s427_s3 }
  0x17   :  { %p284_p10 = pnand %p282_p9, %p279_p8 }
  0x19   :  { %287 = shalt.err (!%p284_p10)
}
  0x1a   :  { %s288_s16 = scalar_lea.vmem %s35_s8, 256  ;;  %p293_p12 = scmp.lt.s32.totalorder %s35_s8, %s35_s8 }
  0x1b   :  { %p289_p11 = scmp.ne.s32.totalorder %s35_s8, %s288_s16  ;;  %p294_p13 = scmp.lt.s32.totalorder %s288_s16, %s288_s16 }
  0x1d   :  { %p295_p0 = por %p294_p13, %p293_p12 }
  0x1f   :  { %p296_p1 = pnand %p295_p0, %p289_p11 }
  0x21   :  { %299 = shalt.err (!%p296_p1)
}
  0x22   :  { %s332_s0 = smov 64   ;;  %s333_s17 = smov 4  }
  0x23   :  { %40 = dma.hbm_to_vmem [thread:$0]  %s427_s3, 256, %s35_s8, [#allocation7], %s332_s0, %s332_s0, %s333_s17  }
  0x24   :  { %322 = dma.done.wait [#allocation4], 256  }
  0x25   :  { %323 = vsyncadd [#allocation4], 4294967040 }
  0x26   :  { %324 = dma.done.wait [#allocation7], 256  }
  0x27   :  { %325 = vsyncadd [#allocation7], 4294967040  ;;  %vm58_vm0 = vcmask 261120   ;;  %v54_v0 = vld [vmem:[#allocation3] sm:$0xff]  ;;  %v55_v1 = vld [vmem:[#allocation3 + $0x8] sm:$0xff]  ;;  %v334_v15 = vmov 0.0  }
  0x28   :  { %v59_v2 = vsel %vm58_vm0, %v54_v0, 0.0  ;;  %v62_v3 = vsel %vm58_vm0, %v55_v1, 0.0  ;;  %v246_v14 = vld [vmem:[#allocation6] sm:$0xff]   ;;  %229 = vmatprep.subr.bf16.mxu0 %v334_v15  ;;  %v247_v16 = vld [vmem:[#allocation6 + $0x8] sm:$0xff]   ;;  %vm335_vm1 = vmmov 0   ;;  %vm195_vm6 = vcmask 781312  }
  0x29   :  { %60 = vadd.xlane.f32.xlu0 %v59_v2  ;;  %230 = vmatpush3.bf16.msra.mxu0 %v246_v14  ;;  %v216_v33 = vld [vmem:[%s425_s1] ss:$0 sm:$0xff]  ;;  %s336_s24 = smov [#allocation8]  }
  0x2a   :  { %233 = vmatprep.mubr.msk.bf16.mxu0 %vm335_vm1, %v334_v15  ;;  %231 = vmatprep.subr.bf16.mxu0 %v334_v15  ;;  %v217_v39 = vld [vmem:[%s426_s2] ss:$0 sm:$0xff]  ;;  %s203_s2 = sshll.u32 %s336_s24, 4  ;;  %s204_s2 = int_to_ptr.vmem [resolvable:$true] %s203_s2 }
  0x2b   :  { %v218_v45 = vld [vmem:[%s428_s4] ss:$0 sm:$0xff]  ;;  %s300_s25 = scalar_lea.vmem %s204_s2, 128  ;;  %p305_p3 = scmp.lt.s32.totalorder %s204_s2, %s204_s2 }
  0x2c   :  { %p301_p2 = scmp.ne.s32.totalorder %s204_s2, %s300_s25  ;;  %p306_p4 = scmp.lt.s32.totalorder %s300_s25, %s300_s25 }
  0x2d   :  { %63 = vadd.xlane.f32.xlu0 %v62_v3  ;;  %232 = vmatpush3.bf16.msra.mxu0 %v247_v16 }
  0x2e   :  { %p307_p5 = por %p306_p4, %p305_p3 }
  0x30   :  { %p308_p6 = pnand %p307_p5, %p301_p2 }
  0xb6   :  { %v61_v4 = vpop.xlane.xlu0 %60 }
  0xb7   :  { %v66_v5 = vmul.f32 0.03125, %v61_v4 }
  0xb9   :  { %v68_v6 = vsub.f32 %v54_v0, %v66_v5 }
  0xba   :  { %v64_v7 = vpop.xlane.xlu0 %63 }
  0xbb   :  { %v67_v8 = vmul.f32 0.03125, %v64_v7  ;;  %v70_v9 = vmul.f32 %v68_v6, %v68_v6  ;;  %v104_v35 = vmul.f32 %v216_v33, %v68_v6 }
  0xbd   :  { %v69_v10 = vsub.f32 %v55_v1, %v67_v8  ;;  %v72_v11 = vsel %vm58_vm0, %v70_v9, 0.0 }
  0xbe   :  { %73 = vadd.xlane.f32.xlu1 %v72_v11 }
  0xbf   :  { %v71_v12 = vmul.f32 %v69_v10, %v69_v10  ;;  %v105_v36 = vmul.f32 %v216_v33, %v69_v10 }
  0xc1   :  { %v75_v13 = vsel %vm58_vm0, %v71_v12, 0.0 }
  0xc2   :  { %76 = vadd.xlane.f32.xlu1 %v75_v13 }
 0x14b   :  { %v74_v17 = vpop.xlane.xlu1 %73 }
 0x14c   :  { %v78_v18 = vmul.f32 0.032258064, %v74_v17 }
 0x14e   :  { %248 = vrsqrt.f32 %v78_v18  ;;  %vm82_vm2 = vcmp.eq.f32.partialorder %v78_v18, inf  ;;  %v85_v23 = vand.u32 2147483648, %v78_v18  ;;  %vm84_vm3 = vcmp.eq.f32.partialorder %v78_v18, 0.0 }
 0x14f   :  { %v77_v19 = vpop.xlane.xlu1 %76 }
 0x150   :  { %v79_v20 = vmul.f32 0.032258064, %v77_v19 }
 0x152   :  { %250 = vrsqrt.f32 %v79_v20  ;;  %vm89_vm4 = vcmp.eq.f32.partialorder %v79_v20, inf  ;;  %v92_v29 = vand.u32 2147483648, %v79_v20  ;;  %vm91_vm5 = vcmp.eq.f32.partialorder %v79_v20, 0.0 }
 0x158   :  { %v249_v21 = vpop.eup %248 }
 0x159   :  { %v81_v22 = vmul.f32 %v249_v21, %v78_v18 }
 0x15b   :  { %v83_v24 = vsel %vm82_vm2, %v78_v18, %v81_v22 }
 0x15c   :  { %v251_v25 = vpop.eup %250  ;;  %v86_v26 = vsel %vm84_vm3, %v85_v23, %v83_v24 }
 0x15d   :  { %v94_v27 = vadd.f32 1e-06, %v86_v26  ;;  %v88_v28 = vmul.f32 %v251_v25, %v79_v20 }
 0x15f   :  { %252 = vrcp.f32 %v94_v27  ;;  %v90_v30 = vsel %vm89_vm4, %v79_v20, %v88_v28 }
 0x160   :  { %v93_v31 = vsel %vm91_vm5, %v92_v29, %v90_v30 }
 0x161   :  { %v95_v32 = vadd.f32 1e-06, %v93_v31 }
 0x163   :  { %254 = vrcp.f32 %v95_v32 }
 0x169   :  { %v253_v34 = vpop.eup %252 }
 0x16a   :  { %v106_v37 = vmul.f32 %v253_v34, %v104_v35 }
 0x16c   :  { %v114_v41 = vadd.f32 %v217_v39, %v106_v37 }
 0x16d   :  { %v255_v38 = vpop.eup %254 }
 0x16e   :  { %v107_v40 = vmul.f32 %v255_v38, %v105_v36 }
 0x170   :  { %v115_v42 = vadd.f32 %v217_v39, %v107_v40 }
 0x172   :  { %v116_v43 = vpack.c.bf16 %v115_v42, %v114_v41 }
 0x174   :  { %117 = vst.msk [vmem:[#allocation2] sm:$0xff] %vm58_vm0, %v116_v43 }
 0x17b   :  { %v118_v44 = vld [vmem:[#allocation2] sm:$0xff] }
 0x17c   :  { %234 = vmatmul.mubr.msk.bf16.vlgmr.msra.gmra.mrb[0].mxu0 %vm58_vm0, %v118_v44 }
 0x24f   :  { %v180_v46 = vpop.f32.mrb[0].mxu0 }
 0x250   :  { %v181_v47 = vadd.f32 %v218_v45, %v180_v46  ;;  %v235_v48 = vpop.f32.mrb[1].mxu0 }
 0x251   :  { %v183_v49 = vpop.f32.mrb[2].mxu0 }
 0x252   :  { %v224_v50 = vpack.c.bf16 %v181_v47, %v181_v47  ;;  %v184_v51 = vadd.f32 %v218_v45, %v183_v49  ;;  %v236_v52 = vpop.f32.mrb[3].mxu0 }
 0x254   :  { %v225_v53 = vpack.c.bf16 %v184_v51, %v184_v51  ;;  %196 = vst.msk [vmem:[#allocation8] sm:$0xf] %vm195_vm6, %v224_v50 }
 0x256   :  { %197 = vst.msk [vmem:[#allocation8 + $0x4] sm:$0xf] %vm195_vm6, %v225_v53 }
 0x257   :  { %311 = shalt.err (!%p308_p6)
}
 0x258   :  { %s312_s27 = scalar_lea.hbm %s429_s5, 128 }
 0x259   :  { %p313_p7 = scmp.ne.s32.totalorder %s429_s5, %s312_s27  ;;  %p316_p8 = scmp.lt.u32.totalorder %s312_s27, %s429_s5 }
 0x25b   :  { %p318_p9 = pnand %p316_p8, %p313_p7 }
 0x25d   :  { %321 = shalt.err (!%p318_p9)
}
 0x25e   :  { %209 = dma.vmem_to_hbm [thread:$0]  %s204_s2, 128, %s429_s5, [#allocation5], %s332_s0, %s332_s0, %s333_s17  }
 0x25f   :  { %326 = dma.done.wait [#allocation5], 128  }
 0x260   :  { %327 = vsyncadd [#allocation5], 4294967168 }
 0x261   :  { %213 = vsyncpa [#allocation4], 1 }
 0x262   :  { %214 = vsyncpa [#allocation7], 1 }
 0x263   :  { %215 = vsyncpa [#allocation5], 1 }

</bundles_post_ra>
